<compile_context>
chip_gen: v7x
topology: tpu7x:2x2x1
jax: 0.10.0
libtpu: 0.0.40
codegen_flags: <defaults>
</compile_context>

<pallas_src>
import jax
import jax.numpy as jnp
from jax.experimental import pallas as pl
from jax.experimental.pallas import tpu as pltpu


def _round_up(x: int, m: int) -> int:
    return ((x + m - 1) // m) * m


def _sublane_multiple(dtype) -> int:
    size = jnp.dtype(dtype).itemsize
    if size >= 4:
        return 8
    if size == 2:
        return 16
    return 32


def _make_linear_kernel(has_bias: bool, use_scratch: bool):
    """Build a matmul kernel variant.

    Refs (in order): x (tm,tk), w (tk,tn), [bias (1,tn)], out (tm,tn), [acc (tm,tn) f32].
    When use_scratch=False the (resident-across-K) output tile doubles as the
    f32 accumulator.
    """

    def kernel(*refs):
        if has_bias:
            x_ref, w_ref, b_ref = refs[0], refs[1], refs[2]
            rest = refs[3:]
        else:
            x_ref, w_ref = refs[0], refs[1]
            b_ref = None
            rest = refs[2:]
        if use_scratch:
            o_ref, acc_ref = rest
        else:
            (o_ref,) = rest
            acc_ref = o_ref  # f32 output accumulates in place

        k = pl.program_id(2)

        @pl.when(k == 0)
        def _():
            acc_ref[...] = jnp.zeros_like(acc_ref)

        # Canonical (tm,tk) @ (tk,tn) contraction on the MXU, f32 accumulation.
        acc_ref[...] += jnp.dot(
            x_ref[...], w_ref[...], preferred_element_type=jnp.float32
        )

        if has_bias or use_scratch:

            @pl.when(k == pl.num_programs(2) - 1)
            def _():
                acc = acc_ref[...]
                if has_bias:
                    acc = acc + b_ref[...].astype(acc.dtype)
                o_ref[...] = acc.astype(o_ref.dtype)

    return kernel


def linear_pallas(x, weight, bias=None, *, tm_max=512, tn_max=512, tk_max=None):
    """Equivalent of torch.nn.functional.linear(x, weight, bias).

    x:      (..., in_features)
    weight: (out_features, in_features)   (native PyTorch layout)
    bias:   (out_features,) or None
    """
    out_features, in_features = weight.shape
    lead_shape = x.shape[:-1]
    M = 1
    for d in lead_shape:
        M *= d
    K, N = in_features, out_features

    in_dtype = x.dtype
    out_dtype = x.dtype
    in_itemsize = jnp.dtype(in_dtype).itemsize
    out_itemsize = jnp.dtype(out_dtype).itemsize
    sub_m = _sublane_multiple(in_dtype)

    if tk_max is None:
        tk_max = 1024 if in_itemsize >= 4 else 2048

    # Tile sizes: clamp to (padded) problem size, keep (8,128)-compatible tiles.
    tm = min(tm_max, _round_up(M, sub_m))
    tn = min(tn_max, _round_up(N, 128))
    tk = min(tk_max, _round_up(K, 128))

    Mp = _round_up(M, tm)
    # v7x has 2 TensorCores sharded over "parallel" axes: if M yields a single
    # block, split N into >=2 blocks so both cores get work (decode shapes).
    if Mp // tm == 1 and N > 128:
        tn = min(tn, _round_up(-(-N // 2), 128))
    Np = _round_up(N, tn)
    Kp = _round_up(K, tk)

    # --- Prepare operands (pads are one-time copies; XLA folds them for
    #     static weights when this wrapper is jitted with constant weights). ---
    x2d = x.reshape(M, K)
    if (Mp, Kp) != (M, K):
        x2d = jnp.pad(x2d, ((0, Mp - M), (0, Kp - K)))

    # Pre-transpose weight to (K, N): kernel then does the canonical NN matmul
    # with no per-grid-step weight-tile transpose.
    wT = weight.T
    if (Kp, Np) != (K, N):
        wT = jnp.pad(wT, ((0, Kp - K), (0, Np - N)))

    has_bias = bias is not None
    use_scratch = jnp.dtype(out_dtype) != jnp.dtype(jnp.float32)

    args = [x2d, wT]
    in_specs = [
        pl.BlockSpec((tm, tk), lambda i, j, k: (i, k)),  # activations tile
        pl.BlockSpec((tk, tn), lambda i, j, k: (k, j)),  # weight tile (K, N)
    ]
    if has_bias:
        b2d = bias.reshape(1, N).astype(out_dtype)
        if Np != N:
            b2d = jnp.pad(b2d, ((0, 0), (0, Np - N)))
        args.append(b2d)
        in_specs.append(pl.BlockSpec((1, tn), lambda i, j, k: (0, j)))

    scratch_shapes = []
    if use_scratch:
        scratch_shapes.append(pltpu.VMEM((tm, tn), jnp.float32))

    grid = (Mp // tm, Np // tn, Kp // tk)

    # Honest streamed-traffic estimate (includes tile re-read factors).
    cost = pl.CostEstimate(
        flops=2 * M * K * N,
        transcendentals=0,
        bytes_accessed=(
            M * K * (Np // tn) * in_itemsize
            + N * K * (Mp // tm) * in_itemsize
            + M * N * out_itemsize
        ),
    )

    # Double-buffered stream footprint + resident output/accumulator; cap at
    # 48 MiB so it always fits v7x's 64 MiB physical VMEM.
    vmem_bytes = (
        2 * (tm * tk + tk * tn) * in_itemsize
        + 2 * tm * tn * out_itemsize
        + (tm * tn * 4 if use_scratch else 0)
        + (2 * tn * out_itemsize if has_bias else 0)
    )
    vmem_limit = min(max(vmem_bytes + (4 << 20), 32 << 20), 48 << 20)

    out_padded = pl.pallas_call(
        _make_linear_kernel(has_bias, use_scratch),
        out_shape=jax.ShapeDtypeStruct((Mp, Np), out_dtype),
        grid_spec=pltpu.PrefetchScalarGridSpec(
            num_scalar_prefetch=0,
            grid=grid,
            in_specs=in_specs,
            out_specs=pl.BlockSpec((tm, tn), lambda i, j, k: (i, j)),
            scratch_shapes=scratch_shapes,
        ),
        compiler_params=pltpu.CompilerParams(
            dimension_semantics=("parallel", "parallel", "arbitrary"),
            vmem_limit_bytes=vmem_limit,
        ),
        cost_estimate=cost,
    )(*args)

    out2d = out_padded[:M, :N]
    return out2d.reshape(*lead_shape, N)


if __name__ == "__main__":
    # Small shapes consistent with the Linear module: batch=2, seq=8, hidden=32 -> 64
    batch, seq = 2, 8
    in_features, out_features = 32, 64

    key = jax.random.PRNGKey(0)
    kx, kw, kb = jax.random.split(key, 3)

    x = jax.random.normal(kx, (batch, seq, in_features), dtype=jnp.float32)
    weight = jax.random.normal(kw, (out_features, in_features), dtype=jnp.float32) * 0.05
    bias = jax.random.normal(kb, (out_features,), dtype=jnp.float32) * 0.05

    y = jax.block_until_ready(linear_pallas(x, weight, bias))

    # Reference check against plain JAX (same semantics as F.linear).
    y_ref = x @ weight.T + bias
    assert y.shape == (batch, seq, out_features)
    assert jnp.allclose(y, y_ref, atol=1e-5, rtol=1e-5), "mismatch vs reference"

    # Also exercise the bias=None path of the module (separate no-bias kernel).
    y_nb = jax.block_until_ready(linear_pallas(x, weight, None))
    assert jnp.allclose(y_nb, x @ weight.T, atol=1e-5, rtol=1e-5), "mismatch (no bias)"

    print("KERNEL_OK")
</pallas_src>

<mosaic_0001>
module attributes {stable_mosaic.version = 11 : i64} {
  func.func @kernel(%arg0: i32, %arg1: i32, %arg2: i32, %arg3: memref<16x128xf32, #tpu.memory_space<vmem>>, %arg4: memref<128x128xf32, #tpu.memory_space<vmem>>, %arg5: memref<1x128xf32, #tpu.memory_space<vmem>>, %arg6: memref<16x128xf32, #tpu.memory_space<vmem>>) attributes {dimension_semantics = [#tpu.dimension_semantics<parallel>, #tpu.dimension_semantics<parallel>, #tpu.dimension_semantics<arbitrary>], iteration_bounds = array<i64: 1, 1, 1>, scalar_prefetch = 0 : i64, scratch_operands = 0 : i64, tpu.core_type = #tpu.core_type<tc>, window_params = [{transform_indices = @transform_0, window_bounds = array<i64: 16, 128>}, {transform_indices = @transform_1, window_bounds = array<i64: 128, 128>}, {transform_indices = @transform_2, window_bounds = array<i64: 1, 128>}, {transform_indices = @transform_3, window_bounds = array<i64: 16, 128>}]} {
    %c0_i32 = arith.constant 0 : i32
    %0 = arith.cmpi eq, %arg2, %c0_i32 : i32
    %1 = arith.extui %0 : i1 to i32
    %c0_i32_0 = arith.constant 0 : i32
    %2 = arith.cmpi ne, %1, %c0_i32_0 : i32
    scf.if %2 {
      %cst_10 = arith.constant 0.000000e+00 : f32
      %12 = vector.broadcast %cst_10 : f32 to vector<16x128xf32>
      %c0_11 = arith.constant 0 : index
      %c0_12 = arith.constant 0 : index
      %13 = vector.load %arg6[%c0_11, %c0_12] : memref<16x128xf32, #tpu.memory_space<vmem>>, vector<16x128xf32>
      tpu.vector_store %arg6[%c0_11, %c0_12], %12 {strides = array<i32>} : memref<16x128xf32, #tpu.memory_space<vmem>>, vector<16x128xf32>,
    } else {
    }
    %c0 = arith.constant 0 : index
    %c0_1 = arith.constant 0 : index
    %3 = vector.load %arg6[%c0, %c0_1] : memref<16x128xf32, #tpu.memory_space<vmem>>, vector<16x128xf32>
    %c0_2 = arith.constant 0 : index
    %c0_3 = arith.constant 0 : index
    %4 = vector.load %arg3[%c0_2, %c0_3] : memref<16x128xf32, #tpu.memory_space<vmem>>, vector<16x128xf32>
    %c0_4 = arith.constant 0 : index
    %c0_5 = arith.constant 0 : index
    %5 = vector.load %arg4[%c0_4, %c0_5] : memref<128x128xf32, #tpu.memory_space<vmem>>, vector<128x128xf32>
    %cst = arith.constant dense<0.000000e+00> : vector<16x128xf32>
    %6 = tpu.matmul %4, %5, %cst {dimension_numbers = #tpu.dot_dimension_numbers<[1], [0], [0], [1], [0, 0, 1, 1], [], []>} : vector<16x128xf32>, vector<128x128xf32>, vector<16x128xf32> -> vector<16x128xf32>
    %7 = arith.addf %3, %6 : vector<16x128xf32>
    %c0_6 = arith.constant 0 : index
    %c0_7 = arith.constant 0 : index
    %8 = vector.load %arg6[%c0_6, %c0_7] : memref<16x128xf32, #tpu.memory_space<vmem>>, vector<16x128xf32>
    tpu.vector_store %arg6[%c0_6, %c0_7], %7 {strides = array<i32>} : memref<16x128xf32, #tpu.memory_space<vmem>>, vector<16x128xf32>,
    %c0_i32_8 = arith.constant 0 : i32
    %9 = arith.cmpi eq, %arg2, %c0_i32_8 : i32
    %10 = arith.extui %9 : i1 to i32
    %c0_i32_9 = arith.constant 0 : i32
    %11 = arith.cmpi ne, %10, %c0_i32_9 : i32
    scf.if %11 {
      %c0_10 = arith.constant 0 : index
      %c0_11 = arith.constant 0 : index
      %12 = vector.load %arg6[%c0_10, %c0_11] : memref<16x128xf32, #tpu.memory_space<vmem>>, vector<16x128xf32>
      %c0_12 = arith.constant 0 : index
      %c0_13 = arith.constant 0 : index
      %13 = vector.load %arg5[%c0_12, %c0_13] : memref<1x128xf32, #tpu.memory_space<vmem>>, vector<1x128xf32>
      %14 = vector.broadcast %13 : vector<1x128xf32> to vector<16x128xf32>
      %15 = arith.addf %12, %14 : vector<16x128xf32>
      %c0_14 = arith.constant 0 : index
      %c0_15 = arith.constant 0 : index
      %16 = vector.load %arg6[%c0_14, %c0_15] : memref<16x128xf32, #tpu.memory_space<vmem>>, vector<16x128xf32>
      tpu.vector_store %arg6[%c0_14, %c0_15], %15 {strides = array<i32>} : memref<16x128xf32, #tpu.memory_space<vmem>>, vector<16x128xf32>,
    } else {
    }
    return
  }
  func.func @transform_0(%arg0: i32, %arg1: i32, %arg2: i32) -> (i32, i32) {
    %c0_i32 = arith.constant 0 : i32
    return %arg0, %arg2 : i32, i32
  }
  func.func @transform_1(%arg0: i32, %arg1: i32, %arg2: i32) -> (i32, i32) {
    %c0_i32 = arith.constant 0 : i32
    return %arg2, %arg1 : i32, i32
  }
  func.func @transform_2(%arg0: i32, %arg1: i32, %arg2: i32) -> (i32, i32) {
    %c0_i32 = arith.constant 0 : i32
    %c0_i32_0 = arith.constant 0 : i32
    return %c0_i32, %arg1 : i32, i32
  }
  func.func @transform_3(%arg0: i32, %arg1: i32, %arg2: i32) -> (i32, i32) {
    %c0_i32 = arith.constant 0 : i32
    return %arg0, %arg1 : i32, i32
  }
}

</mosaic_0001>

<bundles_post_ra>
// kernel: tpu_custom_call.1
= control target key start
LH: loop header
LB: loop body
LE: loop exit
PB: predicated region body
PF: predicated region fallthrough
CT: control target
= control target key end

     0   :  { %8 = vsyncpa [#allocation3], 0  ;;  %s419_s0 = inlined_call_operand.hbm [shape: f32[16,128], index: 0, kind: input, shape index: {}]   ;;  %s420_s1 = inlined_call_operand.hbm [shape: f32[128,128], index: 1, kind: input, shape index: {}]   ;;  %s421_s2 = inlined_call_operand.vmem [shape: f32[1,128], index: 2, kind: input, shape index: {}]   ;;  %s422_s3 = inlined_call_operand.hbm [shape: f32[16,128], index: 3, kind: output, shape index: {}]  }
   0x1   :  { %9 = vsyncpa [#allocation6], 0 }
   0x2   :  { %10 = vsyncpa [#allocation4], 0  ;;  %s346_s12 = smov [#allocation2]   ;;  %s274_s16 = scalar_lea.hbm %s419_s0, 256 }
   0x3   :  { %s16_s13 = sshll.u32 %s346_s12, 4  ;;  %p275_p0 = scmp.ne.s32.totalorder %s419_s0, %s274_s16  ;;  %s17_s13 = int_to_ptr.vmem [resolvable:$true] %s16_s13 }
   0x4   :  { %p278_p1 = scmp.lt.u32.totalorder %s274_s16, %s419_s0 }
   0x6   :  { %p280_p2 = pnand %p278_p1, %p275_p0 }
   0x8   :  { %283 = shalt.err (!%p280_p2)
}
   0x9   :  { %s284_s21 = scalar_lea.vmem %s17_s13, 256  ;;  %p289_p4 = scmp.lt.s32.totalorder %s17_s13, %s17_s13 }
   0xa   :  { %p285_p3 = scmp.ne.s32.totalorder %s17_s13, %s284_s21  ;;  %p290_p5 = scmp.lt.s32.totalorder %s284_s21, %s284_s21 }
   0xc   :  { %p291_p6 = por %p290_p5, %p289_p4 }
   0xe   :  { %p292_p7 = pnand %p291_p6, %p285_p3 }
  0x10   :  { %295 = shalt.err (!%p292_p7)
}
  0x11   :  { %s347_s22 = smov 128   ;;  %s348_s23 = smov 8  }
  0x12   :  { %22 = dma.hbm_to_vmem [thread:$0]  %s419_s0, 256, %s17_s13, [#allocation3], %s347_s22, %s347_s22, %s348_s23  }
  0x13   :  { %s349_s26 = smov [#allocation5]   ;;  %s296_s30 = scalar_lea.hbm %s420_s1, 2048 }
  0x14   :  { %s28_s27 = sshll.u32 %s349_s26, 4  ;;  %p297_p8 = scmp.ne.s32.totalorder %s420_s1, %s296_s30  ;;  %s29_s27 = int_to_ptr.vmem [resolvable:$true] %s28_s27 }
  0x15   :  { %p300_p9 = scmp.lt.u32.totalorder %s296_s30, %s420_s1 }
  0x17   :  { %p302_p10 = pnand %p300_p9, %p297_p8 }
  0x19   :  { %305 = shalt.err (!%p302_p10)
}
  0x1a   :  { %s306_s8 = scalar_lea.vmem %s29_s27, 2048  ;;  %p311_p12 = scmp.lt.s32.totalorder %s29_s27, %s29_s27 }
  0x1b   :  { %p307_p11 = scmp.ne.s32.totalorder %s29_s27, %s306_s8  ;;  %p312_p13 = scmp.lt.s32.totalorder %s306_s8, %s306_s8 }
  0x1d   :  { %p313_p0 = por %p312_p13, %p311_p12 }
  0x1f   :  { %p314_p1 = pnand %p313_p0, %p307_p11 }
  0x21   :  { %317 = shalt.err (!%p314_p1)
}
  0x22   :  { %34 = dma.hbm_to_vmem [thread:$0]  %s420_s1, 2048, %s29_s27, [#allocation6], %s347_s22, %s347_s22, %s348_s23  }
  0x23   :  { %340 = dma.done.wait [#allocation3], 256  }
  0x24   :  { %341 = vsyncadd [#allocation3], 4294967040 }
  0x25   :  { %342 = dma.done.wait [#allocation6], 2048  }
  0x26   :  { %343 = vsyncadd [#allocation6], 4294965248  ;;  %v53_v0 = vld [vmem:[#allocation5] sm:$0xff]  ;;  %v54_v1 = vld [vmem:[#allocation5 + $0x8] sm:$0xff]  ;;  %s350_s11 = smov [#allocation7]  }
  0x27   :  { %v55_v2 = vld [vmem:[#allocation5 + $0x10] sm:$0xff]  ;;  %v236_v3 = vpack.c.bf16 %v54_v1, %v53_v0  ;;  %v56_v4 = vld [vmem:[#allocation5 + $0x18] sm:$0xff]  ;;  %v57_v6 = vld [vmem:[#allocation5 + $0x20] sm:$0xff]  ;;  %s169_s12 = sshll.u32 %s350_s11, 4  ;;  %s170_s12 = int_to_ptr.vmem [resolvable:$true] %s169_s12 }
  0x28   :  { %v240_v5 = vpack.c.bf16 %v56_v4, %v55_v2  ;;  %v58_v7 = vld [vmem:[#allocation5 + $0x28] sm:$0xff]  ;;  %v51_v9 = vld [vmem:[#allocation2] sm:$0xff]  ;;  %v60_v11 = vld [vmem:[#allocation5 + $0x38] sm:$0xff]  ;;  %s318_s13 = scalar_lea.vmem %s170_s12, 256  ;;  %p323_p3 = scmp.lt.s32.totalorder %s170_s12, %s170_s12 }
  0x29   :  { %237 = vmatprep.subr.bf16.mxu0 %v236_v3  ;;  %v244_v8 = vpack.c.bf16 %v58_v7, %v57_v6  ;;  %v59_v10 = vld [vmem:[#allocation5 + $0x30] sm:$0xff]  ;;  %233 = vmatprep.mubr.f32.mxu0 %v51_v9  ;;  %v61_v13 = vld [vmem:[#allocation5 + $0x40] sm:$0xff]  ;;  %v62_v14 = vld [vmem:[#allocation5 + $0x48] sm:$0xff]  ;;  %p319_p2 = scmp.ne.s32.totalorder %s170_s12, %s318_s13  ;;  %p324_p4 = scmp.lt.s32.totalorder %s318_s13, %s318_s13 }
  0x2a   :  { %239 = vmatpush3.bf16.msra.mxu0 %v236_v3  ;;  %v248_v12 = vpack.c.bf16 %v60_v11, %v59_v10  ;;  %v252_v15 = vpack.c.bf16 %v62_v14, %v61_v13  ;;  %v63_v16 = vld [vmem:[#allocation5 + $0x50] sm:$0xff]  ;;  %v64_v17 = vld [vmem:[#allocation5 + $0x58] sm:$0xff]  ;;  %v65_v19 = vld [vmem:[#allocation5 + $0x60] sm:$0xff] }
  0x2b   :  { %241 = vmatprep.subr.bf16.mxu0 %v240_v5  ;;  %v256_v18 = vpack.c.bf16 %v64_v17, %v63_v16  ;;  %v66_v20 = vld [vmem:[#allocation5 + $0x68] sm:$0xff]  ;;  %v67_v22 = vld [vmem:[#allocation5 + $0x70] sm:$0xff]  ;;  %v68_v23 = vld [vmem:[#allocation5 + $0x78] sm:$0xff]  ;;  %p325_p5 = por %p324_p4, %p323_p3 }
  0x2c   :  { %v260_v21 = vpack.c.bf16 %v66_v20, %v65_v19  ;;  %v264_v24 = vpack.c.bf16 %v68_v23, %v67_v22  ;;  %v52_v25 = vld [vmem:[#allocation2 + $0x8] sm:$0xff]  ;;  %v182_v27 = vld [vmem:[%s421_s2] ss:$0 sm:$0xff] }
  0x2d   :  { %p326_p6 = pnand %p325_p5, %p319_p2 }
  0x2e   :  { %243 = vmatpush3.bf16.msra.mxu0 %v240_v5 }
  0x2f   :  { %245 = vmatprep.subr.bf16.mxu0 %v244_v8 }
  0x32   :  { %247 = vmatpush3.bf16.msra.mxu0 %v244_v8 }
  0x33   :  { %249 = vmatprep.subr.bf16.mxu0 %v248_v12 }
  0x36   :  { %251 = vmatpush3.bf16.msra.mxu0 %v248_v12 }
  0x37   :  { %253 = vmatprep.subr.bf16.mxu0 %v252_v15 }
  0x3a   :  { %255 = vmatpush3.bf16.msra.mxu0 %v252_v15 }
  0x3b   :  { %257 = vmatprep.subr.bf16.mxu0 %v256_v18 }
  0x3e   :  { %259 = vmatpush3.bf16.msra.mxu0 %v256_v18 }
  0x3f   :  { %261 = vmatprep.subr.bf16.mxu0 %v260_v21 }
  0x42   :  { %263 = vmatpush3.bf16.msra.mxu0 %v260_v21 }
  0x43   :  { %265 = vmatprep.subr.bf16.mxu0 %v264_v24 }
  0x46   :  { %267 = vmatpush3.bf16.msra.mxu0 %v264_v24 }
  0x49   :  { %234 = vmatmul.mubr.f32.vlgmr.msra.gmra.mrb[0].mxu0 %v52_v25 }
 0x11c   :  { %v235_v26 = vpop.f32.mrb[0].mxu0 }
 0x11d   :  { %v135_v28 = vpop.f32.mrb[1].mxu0  ;;  %v161_v29 = vadd.f32 %v235_v26, %v182_v27 }
 0x11e   :  { %v160_v30 = vadd.f32 %v182_v27, %v135_v28 }
 0x11f   :  { %163 = vst [vmem:[#allocation7 + $0x8] sm:$0xff] %v161_v29 }
 0x120   :  { %162 = vst [vmem:[#allocation7] sm:$0xff] %v160_v30 }
 0x121   :  { %329 = shalt.err (!%p326_p6)
}
 0x122   :  { %s330_s16 = scalar_lea.hbm %s422_s3, 256 }
 0x123   :  { %p331_p7 = scmp.ne.s32.totalorder %s422_s3, %s330_s16  ;;  %p334_p8 = scmp.lt.u32.totalorder %s330_s16, %s422_s3 }
 0x125   :  { %p336_p9 = pnand %p334_p8, %p331_p7 }
 0x127   :  { %339 = shalt.err (!%p336_p9)
}
 0x128   :  { %175 = dma.vmem_to_hbm [thread:$0]  %s170_s12, 256, %s422_s3, [#allocation4], %s347_s22, %s347_s22, %s348_s23  }
 0x129   :  { %344 = dma.done.wait [#allocation4], 256  }
 0x12a   :  { %345 = vsyncadd [#allocation4], 4294967040 }
 0x12b   :  { %179 = vsyncpa [#allocation3], 1 }
 0x12c   :  { %180 = vsyncpa [#allocation6], 1 }
 0x12d   :  { %181 = vsyncpa [#allocation4], 1 }

</bundles_post_ra>
